<compile_context>
chip_gen: v7x
topology: tpu7x:2x2x1
jax: 0.10.0
libtpu: 0.0.40
codegen_flags: <defaults>
</compile_context>

<pallas_src>
import jax
import jax.numpy as jnp
from jax.experimental import pallas as pl
from jax.experimental.pallas import tpu as pltpu


def _round_up(n, m):
    return ((n + m - 1) // m) * m


def encoder_kernel(x_ref, w1_ref, b1_ref, w2_ref, b2_ref, w3_ref, b3_ref, out_ref):
    # lin1 + ReLU (f32 accumulation off the MXU)
    h1 = jnp.dot(x_ref[...], w1_ref[...], preferred_element_type=jnp.float32)
    h1 = jnp.maximum(h1 + b1_ref[...], 0.0)
    # lin2 + ReLU
    h2 = jnp.dot(h1.astype(w2_ref.dtype), w2_ref[...],
                 preferred_element_type=jnp.float32)
    h2 = jnp.maximum(h2 + b2_ref[...], 0.0)
    # fused heads: [lin31 | lin32] in one matmul, lane-padded output slab
    y = jnp.dot(h2.astype(w3_ref.dtype), w3_ref[...],
                preferred_element_type=jnp.float32)
    out_ref[...] = (y + b3_ref[...]).astype(out_ref.dtype)


def encoder_forward(x, params, *, block_b=256, compute_dtype=jnp.bfloat16):
    """x: (B, x_dim). params: pre-transposed (in, out) weights + (1, out) biases."""
    B, x_dim = x.shape
    z_dim = params["w31"].shape[1]

    # --- head fusion + lane padding (one-time, free XLA ops in the wrapper) ---
    n_out = 2 * z_dim
    n_pad = _round_up(n_out, 128)  # lane-dense output slab (unmasked vst)
    w3 = jnp.concatenate([params["w31"], params["w32"]], axis=1)
    b3 = jnp.concatenate([params["b31"], params["b32"]], axis=1)
    if n_pad != n_out:
        w3 = jnp.pad(w3, ((0, 0), (0, n_pad - n_out)))
        b3 = jnp.pad(b3, ((0, 0), (0, n_pad - n_out)))

    # --- bf16 matmul operands, f32 biases / accumulators / activations ---
    xc = x.astype(compute_dtype)
    w1 = params["w1"].astype(compute_dtype)
    w2 = params["w2"].astype(compute_dtype)
    w3 = w3.astype(compute_dtype)
    b1 = params["b1"].astype(jnp.float32)
    b2 = params["b2"].astype(jnp.float32)
    b3 = b3.astype(jnp.float32)

    # --- batch tiling: bounded VMEM footprint + auto double-buffered x/out DMAs ---
    tb = min(block_b, _round_up(B, 8))
    b_pad = _round_up(B, tb)
    if b_pad != B:
        xc = jnp.pad(xc, ((0, b_pad - B), (0, 0)))
    n_blocks = b_pad // tb

    # Weights/biases use a constant index_map so they stay VMEM-resident
    # across all grid steps (no re-DMA).
    resident = lambda a: pl.BlockSpec(a.shape, lambda i: (0,) * a.ndim)

    out = pl.pallas_call(
        encoder_kernel,
        out_shape=jax.ShapeDtypeStruct((b_pad, n_pad), jnp.float32),
        grid=(n_blocks,),
        in_specs=[
            pl.BlockSpec((tb, x_dim), lambda i: (i, 0)),  # x streamed per batch tile
            resident(w1), resident(b1),
            resident(w2), resident(b2),
            resident(w3), resident(b3),
        ],
        out_specs=pl.BlockSpec((tb, n_pad), lambda i: (i, 0)),
        compiler_params=pltpu.CompilerParams(
            dimension_semantics=("parallel",),  # batch axis is embarrassingly parallel
        ),
    )(xc, w1, b1, w2, b2, w3, b3)

    out = out[:B, :n_out]
    return out[:, :z_dim], out[:, z_dim:]


def init_params(key, x_dim, h_dim1, h_dim2, z_dim):
    """Deterministic init; weights stored as (in, out) = PyTorch weight.T."""
    ks = jax.random.split(key, 8)

    def lin(kw, kb, fan_in, fan_out):
        bound = 1.0 / jnp.sqrt(fan_in)
        w = jax.random.uniform(kw, (fan_in, fan_out), jnp.float32, -bound, bound)
        b = jax.random.uniform(kb, (1, fan_out), jnp.float32, -bound, bound)
        return w, b

    w1, b1 = lin(ks[0], ks[1], x_dim, h_dim1)
    w2, b2 = lin(ks[2], ks[3], h_dim1, h_dim2)
    w31, b31 = lin(ks[4], ks[5], h_dim2, z_dim)
    w32, b32 = lin(ks[6], ks[7], h_dim2, z_dim)
    return dict(w1=w1, b1=b1, w2=w2, b2=b2, w31=w31, b31=b31, w32=w32, b32=b32)


def encoder_reference(x, p, compute_dtype=jnp.bfloat16):
    """Pure-JAX reference with the same bf16-operand / f32-accumulate numerics."""
    c = lambda a: a.astype(compute_dtype)
    h1 = jnp.maximum(
        jnp.dot(c(x), c(p["w1"]), preferred_element_type=jnp.float32) + p["b1"], 0.0)
    h2 = jnp.maximum(
        jnp.dot(c(h1), c(p["w2"]), preferred_element_type=jnp.float32) + p["b2"], 0.0)
    mu = jnp.dot(c(h2), c(p["w31"]), preferred_element_type=jnp.float32) + p["b31"]
    lv = jnp.dot(c(h2), c(p["w32"]), preferred_element_type=jnp.float32) + p["b32"]
    return mu, lv


if __name__ == "__main__":
    B, x_dim, h_dim1, h_dim2, z_dim = 16, 32, 64, 64, 16

    key = jax.random.PRNGKey(0)
    kx, kp = jax.random.split(key)
    x = jax.random.normal(kx, (B, x_dim), jnp.float32)
    params = init_params(kp, x_dim, h_dim1, h_dim2, z_dim)

    mu, logvar = encoder_forward(x, params)
    jax.block_until_ready((mu, logvar))

    mu_ref, logvar_ref = encoder_reference(x, params)
    assert mu.shape == (B, z_dim) and logvar.shape == (B, z_dim)
    assert jnp.allclose(mu, mu_ref, atol=2e-3, rtol=2e-3)
    assert jnp.allclose(logvar, logvar_ref, atol=2e-3, rtol=2e-3)

    print("KERNEL_OK")
</pallas_src>

<mosaic_0001>
module attributes {stable_mosaic.version = 11 : i64} {
  func.func @encoder_kernel(%arg0: i32, %arg1: memref<16x32xbf16, #tpu.memory_space<vmem>>, %arg2: memref<32x64xbf16, #tpu.memory_space<vmem>>, %arg3: memref<1x64xf32, #tpu.memory_space<vmem>>, %arg4: memref<64x64xbf16, #tpu.memory_space<vmem>>, %arg5: memref<1x64xf32, #tpu.memory_space<vmem>>, %arg6: memref<64x128xbf16, #tpu.memory_space<vmem>>, %arg7: memref<1x128xf32, #tpu.memory_space<vmem>>, %arg8: memref<16x128xf32, #tpu.memory_space<vmem>>) attributes {dimension_semantics = [#tpu.dimension_semantics<parallel>], iteration_bounds = array<i64: 1>, scalar_prefetch = 0 : i64, scratch_operands = 0 : i64, tpu.core_type = #tpu.core_type<tc>, window_params = [{transform_indices = @transform_0, window_bounds = array<i64: 16, 32>}, {pipeline_mode = #tpu.pipeline_mode<synchronous>, transform_indices = @transform_1, window_bounds = array<i64: 32, 64>}, {pipeline_mode = #tpu.pipeline_mode<synchronous>, transform_indices = @transform_2, window_bounds = array<i64: 1, 64>}, {pipeline_mode = #tpu.pipeline_mode<synchronous>, transform_indices = @transform_3, window_bounds = array<i64: 64, 64>}, {pipeline_mode = #tpu.pipeline_mode<synchronous>, transform_indices = @transform_4, window_bounds = array<i64: 1, 64>}, {pipeline_mode = #tpu.pipeline_mode<synchronous>, transform_indices = @transform_5, window_bounds = array<i64: 64, 128>}, {pipeline_mode = #tpu.pipeline_mode<synchronous>, transform_indices = @transform_6, window_bounds = array<i64: 1, 128>}, {transform_indices = @transform_7, window_bounds = array<i64: 16, 128>}]} {
    %c0 = arith.constant 0 : index
    %c0_0 = arith.constant 0 : index
    %0 = vector.load %arg1[%c0, %c0_0] : memref<16x32xbf16, #tpu.memory_space<vmem>>, vector<16x32xbf16>
    %c0_1 = arith.constant 0 : index
    %c0_2 = arith.constant 0 : index
    %1 = vector.load %arg2[%c0_1, %c0_2] : memref<32x64xbf16, #tpu.memory_space<vmem>>, vector<32x64xbf16>
    %cst = arith.constant dense<0.000000e+00> : vector<16x64xf32>
    %2 = tpu.matmul %0, %1, %cst {dimension_numbers = #tpu.dot_dimension_numbers<[1], [0], [0], [1], [0, 0, 1, 1], [], []>} : vector<16x32xbf16>, vector<32x64xbf16>, vector<16x64xf32> -> vector<16x64xf32>
    %c0_3 = arith.constant 0 : index
    %c0_4 = arith.constant 0 : index
    %3 = vector.load %arg3[%c0_3, %c0_4] : memref<1x64xf32, #tpu.memory_space<vmem>>, vector<1x64xf32>
    %4 = vector.broadcast %3 : vector<1x64xf32> to vector<16x64xf32>
    %5 = arith.addf %2, %4 : vector<16x64xf32>
    %cst_5 = arith.constant 0.000000e+00 : f32
    %6 = vector.broadcast %cst_5 : f32 to vector<16x64xf32>
    %7 = arith.maximumf %5, %6 : vector<16x64xf32>
    %8 = arith.truncf %7 : vector<16x64xf32> to vector<16x64xbf16>
    %c0_6 = arith.constant 0 : index
    %c0_7 = arith.constant 0 : index
    %9 = vector.load %arg4[%c0_6, %c0_7] : memref<64x64xbf16, #tpu.memory_space<vmem>>, vector<64x64xbf16>
    %cst_8 = arith.constant dense<0.000000e+00> : vector<16x64xf32>
    %10 = tpu.matmul %8, %9, %cst_8 {dimension_numbers = #tpu.dot_dimension_numbers<[1], [0], [0], [1], [0, 0, 1, 1], [], []>} : vector<16x64xbf16>, vector<64x64xbf16>, vector<16x64xf32> -> vector<16x64xf32>
    %c0_9 = arith.constant 0 : index
    %c0_10 = arith.constant 0 : index
    %11 = vector.load %arg5[%c0_9, %c0_10] : memref<1x64xf32, #tpu.memory_space<vmem>>, vector<1x64xf32>
    %12 = vector.broadcast %11 : vector<1x64xf32> to vector<16x64xf32>
    %13 = arith.addf %10, %12 : vector<16x64xf32>
    %cst_11 = arith.constant 0.000000e+00 : f32
    %14 = vector.broadcast %cst_11 : f32 to vector<16x64xf32>
    %15 = arith.maximumf %13, %14 : vector<16x64xf32>
    %16 = arith.truncf %15 : vector<16x64xf32> to vector<16x64xbf16>
    %c0_12 = arith.constant 0 : index
    %c0_13 = arith.constant 0 : index
    %17 = vector.load %arg6[%c0_12, %c0_13] : memref<64x128xbf16, #tpu.memory_space<vmem>>, vector<64x128xbf16>
    %cst_14 = arith.constant dense<0.000000e+00> : vector<16x128xf32>
    %18 = tpu.matmul %16, %17, %cst_14 {dimension_numbers = #tpu.dot_dimension_numbers<[1], [0], [0], [1], [0, 0, 1, 1], [], []>} : vector<16x64xbf16>, vector<64x128xbf16>, vector<16x128xf32> -> vector<16x128xf32>
    %c0_15 = arith.constant 0 : index
    %c0_16 = arith.constant 0 : index
    %19 = vector.load %arg7[%c0_15, %c0_16] : memref<1x128xf32, #tpu.memory_space<vmem>>, vector<1x128xf32>
    %20 = vector.broadcast %19 : vector<1x128xf32> to vector<16x128xf32>
    %21 = arith.addf %18, %20 : vector<16x128xf32>
    %c0_17 = arith.constant 0 : index
    %c0_18 = arith.constant 0 : index
    %22 = vector.load %arg8[%c0_17, %c0_18] : memref<16x128xf32, #tpu.memory_space<vmem>>, vector<16x128xf32>
    tpu.vector_store %arg8[%c0_17, %c0_18], %21 {strides = array<i32>} : memref<16x128xf32, #tpu.memory_space<vmem>>, vector<16x128xf32>,
    return
  }
  func.func @transform_0(%arg0: i32) -> (i32, i32) {
    %c0_i32 = arith.constant 0 : i32
    %c0_i32_0 = arith.constant 0 : i32
    return %arg0, %c0_i32 : i32, i32
  }
  func.func @transform_1(%arg0: i32) -> (i32, i32) {
    %c0_i32 = arith.constant 0 : i32
    %c0_i32_0 = arith.constant 0 : i32
    %c0_i32_1 = arith.constant 0 : i32
    return %c0_i32, %c0_i32_0 : i32, i32
  }
  func.func @transform_2(%arg0: i32) -> (i32, i32) {
    %c0_i32 = arith.constant 0 : i32
    %c0_i32_0 = arith.constant 0 : i32
    %c0_i32_1 = arith.constant 0 : i32
    return %c0_i32, %c0_i32_0 : i32, i32
  }
  func.func @transform_3(%arg0: i32) -> (i32, i32) {
    %c0_i32 = arith.constant 0 : i32
    %c0_i32_0 = arith.constant 0 : i32
    %c0_i32_1 = arith.constant 0 : i32
    return %c0_i32, %c0_i32_0 : i32, i32
  }
  func.func @transform_4(%arg0: i32) -> (i32, i32) {
    %c0_i32 = arith.constant 0 : i32
    %c0_i32_0 = arith.constant 0 : i32
    %c0_i32_1 = arith.constant 0 : i32
    return %c0_i32, %c0_i32_0 : i32, i32
  }
  func.func @transform_5(%arg0: i32) -> (i32, i32) {
    %c0_i32 = arith.constant 0 : i32
    %c0_i32_0 = arith.constant 0 : i32
    %c0_i32_1 = arith.constant 0 : i32
    return %c0_i32, %c0_i32_0 : i32, i32
  }
  func.func @transform_6(%arg0: i32) -> (i32, i32) {
    %c0_i32 = arith.constant 0 : i32
    %c0_i32_0 = arith.constant 0 : i32
    %c0_i32_1 = arith.constant 0 : i32
    return %c0_i32, %c0_i32_0 : i32, i32
  }
  func.func @transform_7(%arg0: i32) -> (i32, i32) {
    %c0_i32 = arith.constant 0 : i32
    %c0_i32_0 = arith.constant 0 : i32
    return %arg0, %c0_i32 : i32, i32
  }
}

</mosaic_0001>

<bundles_post_ra>
// kernel: tpu_custom_call.1
= control target key start
LH: loop header
LB: loop body
LE: loop exit
PB: predicated region body
PF: predicated region fallthrough
CT: control target
= control target key end

     0   :  { %12 = vsyncpa [#allocation3], 0  ;;  %s705_s0 = inlined_call_operand.hbm [shape: bf16[16,32], index: 0, kind: input, shape index: {}]   ;;  %s706_s1 = inlined_call_operand.hbm [shape: bf16[32,64], index: 1, kind: input, shape index: {}]   ;;  %s707_s2 = inlined_call_operand.vmem [shape: f32[1,64], index: 2, kind: input, shape index: {}]   ;;  %s708_s3 = inlined_call_operand.hbm [shape: bf16[64,64], index: 3, kind: input, shape index: {}]   ;;  %s709_s4 = inlined_call_operand.vmem [shape: f32[1,64], index: 4, kind: input, shape index: {}]   ;;  %s710_s5 = inlined_call_operand.hbm [shape: bf16[64,128], index: 5, kind: input, shape index: {}]   ;;  %s711_s6 = inlined_call_operand.vmem [shape: f32[1,128], index: 6, kind: input, shape index: {}]   ;;  %s712_s7 = inlined_call_operand.hbm [shape: f32[16,128], index: 7, kind: output, shape index: {}]  }
   0x1   :  { %13 = vsyncpa [#allocation6], 0 }
   0x2   :  { %14 = vsyncpa [#allocation9], 0 }
   0x3   :  { %15 = vsyncpa [#allocation4], 0  ;;  %s554_s24 = smov [#allocation5]   ;;  %s555_s26 = smov [#allocation2]  }
   0x4   :  { %s33_s25 = sshll.u32 %s554_s24, 4  ;;  %s21_s27 = sshll.u32 %s555_s26, 4  ;;  %s34_s25 = int_to_ptr.vmem [resolvable:$true] %s33_s25  ;;  %s605_s27 = int_to_ptr.vmem [resolvable:$true] %s21_s27 }
   0x5   :  { %s436_s30 = scalar_lea.hbm %s706_s1, 256 }
   0x6   :  { %p437_p0 = scmp.ne.s32.totalorder %s706_s1, %s436_s30  ;;  %p440_p1 = scmp.lt.u32.totalorder %s436_s30, %s706_s1 }
   0x8   :  { %p442_p2 = pnand %p440_p1, %p437_p0 }
   0xa   :  { %445 = shalt.err (!%p442_p2)
}
   0xb   :  { %s446_s12 = scalar_lea.vmem %s34_s25, 256  ;;  %p451_p4 = scmp.lt.s32.totalorder %s34_s25, %s34_s25 }
   0xc   :  { %p447_p3 = scmp.ne.s32.totalorder %s34_s25, %s446_s12  ;;  %p452_p5 = scmp.lt.s32.totalorder %s446_s12, %s446_s12 }
   0xe   :  { %p453_p6 = por %p452_p5, %p451_p4 }
  0x10   :  { %p454_p7 = pnand %p453_p6, %p447_p3 }
  0x12   :  { %457 = shalt.err (!%p454_p7)
}
  0x13   :  { %s556_s13 = smov 64   ;;  %s557_s14 = smov 4  }
  0x14   :  { %39 = dma.hbm_to_vmem [thread:$0]  %s706_s1, 256, %s34_s25, [#allocation6], %s556_s13, %s556_s13, %s557_s14  }
  0x15   :  { %s458_s19 = scalar_lea.hbm %s705_s0, 128 }
  0x16   :  { %p459_p8 = scmp.ne.s32.totalorder %s705_s0, %s458_s19  ;;  %p462_p9 = scmp.lt.u32.totalorder %s458_s19, %s705_s0 }
  0x18   :  { %p464_p10 = pnand %p462_p9, %p459_p8 }
  0x1a   :  { %467 = shalt.err (!%p464_p10)
}
  0x1b   :  { %s468_s24 = scalar_lea.vmem %s605_s27, 128  ;;  %p473_p12 = scmp.lt.s32.totalorder %s605_s27, %s605_s27 }
  0x1c   :  { %p469_p11 = scmp.ne.s32.totalorder %s605_s27, %s468_s24  ;;  %p474_p13 = scmp.lt.s32.totalorder %s468_s24, %s468_s24 }
  0x1e   :  { %p475_p0 = por %p474_p13, %p473_p12 }
  0x20   :  { %p476_p1 = pnand %p475_p0, %p469_p11 }
  0x22   :  { %479 = shalt.err (!%p476_p1)
}
  0x23   :  { %27 = dma.hbm_to_vmem [thread:$0]  %s705_s0, 128, %s605_s27, [#allocation3], %s556_s13, %s556_s13, %s557_s14  }
  0x24   :  { %s558_s26 = smov [#allocation7]   ;;  %s559_s29 = smov [#allocation8]  }
  0x25   :  { %s47_s28 = sshll.u32 %s558_s26, 4  ;;  %s61_s30 = sshll.u32 %s559_s29, 4  ;;  %s48_s28 = int_to_ptr.vmem [resolvable:$true] %s47_s28  ;;  %s642_s30 = int_to_ptr.vmem [resolvable:$true] %s61_s30 }
  0x26   :  { %s480_s10 = scalar_lea.hbm %s708_s3, 512 }
  0x27   :  { %p481_p2 = scmp.ne.s32.totalorder %s708_s3, %s480_s10  ;;  %p484_p3 = scmp.lt.u32.totalorder %s480_s10, %s708_s3 }
  0x29   :  { %p486_p4 = pnand %p484_p3, %p481_p2 }
  0x2b   :  { %489 = shalt.err (!%p486_p4)
}
  0x2c   :  { %s490_s0 = scalar_lea.vmem %s48_s28, 512  ;;  %p495_p6 = scmp.lt.s32.totalorder %s48_s28, %s48_s28 }
  0x2d   :  { %p491_p5 = scmp.ne.s32.totalorder %s48_s28, %s490_s0  ;;  %p496_p7 = scmp.lt.s32.totalorder %s490_s0, %s490_s0 }
  0x2f   :  { %p497_p8 = por %p496_p7, %p495_p6 }
  0x31   :  { %p498_p9 = pnand %p497_p8, %p491_p5 }
  0x33   :  { %501 = shalt.err (!%p498_p9)
}
  0x34   :  { %53 = dma.hbm_to_vmem [thread:$0]  %s708_s3, 512, %s48_s28, [#allocation6], %s556_s13, %s556_s13, %s557_s14  }
  0x35   :  { %s502_s20 = scalar_lea.hbm %s710_s5, 512 }
  0x36   :  { %p503_p10 = scmp.ne.s32.totalorder %s710_s5, %s502_s20  ;;  %p506_p11 = scmp.lt.u32.totalorder %s502_s20, %s710_s5 }
  0x38   :  { %p508_p12 = pnand %p506_p11, %p503_p10 }
  0x3a   :  { %511 = shalt.err (!%p508_p12)
}
  0x3b   :  { %s512_s1 = scalar_lea.vmem %s642_s30, 512  ;;  %p517_p0 = scmp.lt.s32.totalorder %s642_s30, %s642_s30 }
  0x3c   :  { %p513_p13 = scmp.ne.s32.totalorder %s642_s30, %s512_s1  ;;  %p518_p1 = scmp.lt.s32.totalorder %s512_s1, %s512_s1 }
  0x3e   :  { %p519_p2 = por %p518_p1, %p517_p0 }
  0x40   :  { %p520_p3 = pnand %p519_p2, %p513_p13 }
  0x42   :  { %523 = shalt.err (!%p520_p3)
}
  0x43   :  { %67 = dma.hbm_to_vmem [thread:$0]  %s710_s5, 512, %s642_s30, [#allocation9], %s556_s13, %s556_s13, %s557_s14  }
  0x44   :  { %546 = dma.done.wait [#allocation3], 128  }
  0x45   :  { %547 = vsyncadd [#allocation3], 4294967168 }
  0x46   :  { %548 = dma.done.wait [#allocation6], 768  }
  0x47   :  { %549 = vsyncadd [#allocation6], 4294966528 }
  0x48   :  { %550 = dma.done.wait [#allocation9], 512  }
  0x49   :  { %551 = vsyncadd [#allocation9], 4294966784  ;;  %v560_v0 = vmov 0.0   ;;  %vm561_vm0 = vmmov 0   ;;  %v425_v1 = vld [vmem:[#allocation5] sm:$0xff]   ;;  %v426_v2 = vld [vmem:[#allocation5 + $0x8] sm:$0xff]  }
  0x4a   :  { %382 = vmatprep.subr.bf16.mxu0 %v560_v0  ;;  %386 = vmatprep.mubr.msk.bf16.mxu0 %vm561_vm0, %v560_v0  ;;  %v428_v3 = vld [vmem:[#allocation7] sm:$0xff]   ;;  %v427_v4 = vld [vmem:[#allocation2] sm:$0xff]   ;;  %vm113_vm1 = vcmask 261120   ;;  %v430_v6 = vld [vmem:[#allocation7 + $0x10] sm:$0xff]   ;;  %vm200_vm2 = vcmask 523264   ;;  %s562_s29 = smov [#allocation10]  }
  0x4b   :  { %390 = vmatprep.subr.bf16.mxu1 %v560_v0  ;;  %398 = vmatprep.mubr.msk.bf16.mxu1 %vm561_vm0, %v560_v0  ;;  %v429_v5 = vld [vmem:[#allocation7 + $0x8] sm:$0xff]   ;;  %v431_v7 = vld [vmem:[#allocation7 + $0x18] sm:$0xff]   ;;  %v432_v8 = vld [vmem:[#allocation8] sm:$0xff]   ;;  %s338_s30 = sshll.u32 %s562_s29, 4  ;;  %s339_s30 = int_to_ptr.vmem [resolvable:$true] %s338_s30 }
  0x4c   :  { %383 = vmatpush3.bf16.msra.mxu0 %v425_v1  ;;  %391 = vmatpush3.bf16.msra.mxu1 %v428_v3  ;;  %v433_v9 = vld [vmem:[#allocation8 + $0x8] sm:$0xff]   ;;  %v434_v20 = vld [vmem:[#allocation8 + $0x10] sm:$0xff]   ;;  %v435_v21 = vld [vmem:[#allocation8 + $0x18] sm:$0xff]   ;;  %p529_p5 = scmp.lt.s32.totalorder %s339_s30, %s339_s30 }
  0x4d   :  { %384 = vmatprep.subr.bf16.mxu0 %v560_v0  ;;  %392 = vmatprep.subr.bf16.mxu1 %v560_v0  ;;  %v352_v10 = vld [vmem:[%s707_s2] ss:$0 sm:$0xff] }
  0x4e   :  { %v357_v22 = vld [vmem:[%s709_s4] ss:$0 sm:$0xff]  ;;  %s524_s4 = scalar_lea.vmem %s339_s30, 256 }
  0x4f   :  { %v363_v32 = vld [vmem:[%s711_s6] ss:$0 sm:$0xff]  ;;  %p525_p4 = scmp.ne.s32.totalorder %s339_s30, %s524_s4  ;;  %p530_p6 = scmp.lt.s32.totalorder %s524_s4, %s524_s4 }
  0x50   :  { %385 = vmatpush3.bf16.msra.mxu0 %v426_v2  ;;  %393 = vmatpush3.bf16.msra.mxu1 %v429_v5 }
  0x51   :  { %402 = vmatprep.subr.bf16.mxu0 %v560_v0  ;;  %394 = vmatprep.subr.bf16.mxu1 %v560_v0  ;;  %p531_p7 = por %p530_p6, %p529_p5 }
  0x53   :  { %387 = vmatmul.mubr.msk.bf16.vlgmr.msra.gmra.mrb[0].mxu0 %vm113_vm1, %v427_v4  ;;  %p532_p8 = pnand %p531_p7, %p525_p4 }
  0x54   :  { %410 = vmatprep.mubr.msk.bf16.mxu0 %vm561_vm0, %v560_v0  ;;  %395 = vmatpush3.bf16.msra.mxu1 %v430_v6 }
  0x55   :  { %396 = vmatprep.subr.bf16.mxu1 %v560_v0  ;;  %403 = vmatpush3.bf16.msra.mxu0 %v432_v8 }
  0x56   :  { %404 = vmatprep.subr.bf16.mxu0 %v560_v0 }
  0x58   :  { %397 = vmatpush3.bf16.msra.mxu1 %v431_v7 }
  0x59   :  { %405 = vmatpush3.bf16.msra.mxu0 %v433_v9 }
  0x5a   :  { %406 = vmatprep.subr.bf16.mxu0 %v560_v0 }
  0x5d   :  { %407 = vmatpush3.bf16.msra.mxu0 %v434_v20 }
  0x5e   :  { %408 = vmatprep.subr.bf16.mxu0 %v560_v0 }
  0x61   :  { %409 = vmatpush3.bf16.msra.mxu0 %v435_v21 }
 0x126   :  { %v151_v11 = vpop.f32.mrb[0].mxu0 }
 0x127   :  { %v152_v12 = vadd.f32 %v352_v10, %v151_v11  ;;  %v388_v13 = vpop.f32.mrb[1].mxu0 }
 0x128   :  { %v154_v14 = vpop.f32.mrb[2].mxu0 }
 0x129   :  { %v155_v15 = vadd.f32 %v352_v10, %v154_v14  ;;  %v389_v16 = vpop.f32.mrb[3].mxu0  ;;  %v158_v17 = vmax.f32 %v152_v12, 0.0 }
 0x12b   :  { %v159_v18 = vmax.f32 %v155_v15, 0.0 }
 0x12d   :  { %v160_v19 = vpack.c.bf16 %v159_v18, %v158_v17 }
 0x12f   :  { %399 = vmatmul.mubr.msk.bf16.vlgmr.msra.gmra.mrb[0].mxu1 %vm200_vm2, %v160_v19 }
 0x202   :  { %v238_v23 = vpop.f32.mrb[0].mxu1 }
 0x203   :  { %v239_v24 = vadd.f32 %v357_v22, %v238_v23  ;;  %v400_v25 = vpop.f32.mrb[1].mxu1 }
 0x204   :  { %v241_v26 = vpop.f32.mrb[2].mxu1 }
 0x205   :  { %v242_v27 = vadd.f32 %v357_v22, %v241_v26  ;;  %v401_v28 = vpop.f32.mrb[3].mxu1  ;;  %v245_v29 = vmax.f32 %v239_v24, 0.0 }
 0x207   :  { %v246_v30 = vmax.f32 %v242_v27, 0.0 }
 0x209   :  { %v247_v31 = vpack.c.bf16 %v246_v30, %v245_v29 }
 0x20b   :  { %411 = vmatmul.mubr.msk.bf16.vlgmr.msra.gmra.mrb[4].mxu0 %vm200_vm2, %v247_v31 }
 0x2de   :  { %v324_v33 = vpop.f32.mrb[4].mxu0 }
 0x2df   :  { %v325_v34 = vadd.f32 %v363_v32, %v324_v33  ;;  %v412_v35 = vpop.f32.mrb[5].mxu0 }
 0x2e0   :  { %v327_v36 = vpop.f32.mrb[6].mxu0 }
 0x2e1   :  { %331 = vst [vmem:[#allocation10] sm:$0xff] %v325_v34  ;;  %v328_v37 = vadd.f32 %v363_v32, %v327_v36  ;;  %v413_v38 = vpop.f32.mrb[7].mxu0 }
 0x2e3   :  { %332 = vst [vmem:[#allocation10 + $0x8] sm:$0xff] %v328_v37 }
 0x2e4   :  { %535 = shalt.err (!%p532_p8)
}
 0x2e5   :  { %s536_s9 = scalar_lea.hbm %s712_s7, 256 }
 0x2e6   :  { %p537_p9 = scmp.ne.s32.totalorder %s712_s7, %s536_s9  ;;  %p540_p10 = scmp.lt.u32.totalorder %s536_s9, %s712_s7 }
 0x2e8   :  { %p542_p11 = pnand %p540_p10, %p537_p9 }
 0x2ea   :  { %545 = shalt.err (!%p542_p11)
}
 0x2eb   :  { %s563_s16 = smov 128   ;;  %s564_s0 = smov 8  }
 0x2ec   :  { %344 = dma.vmem_to_hbm [thread:$0]  %s339_s30, 256, %s712_s7, [#allocation4], %s563_s16, %s563_s16, %s564_s0  }
 0x2ed   :  { %552 = dma.done.wait [#allocation4], 256  }
 0x2ee   :  { %553 = vsyncadd [#allocation4], 4294967040 }
 0x2ef   :  { %348 = vsyncpa [#allocation3], 1 }
 0x2f0   :  { %349 = vsyncpa [#allocation6], 1 }
 0x2f1   :  { %350 = vsyncpa [#allocation9], 1 }
 0x2f2   :  { %351 = vsyncpa [#allocation4], 1 }

</bundles_post_ra>
